<compile_context>
chip_gen: v7x
topology: tpu7x:2x2x1
jax: 0.10.0
libtpu: 0.0.40
codegen_flags: <defaults>
</compile_context>

<pallas_src>
import functools

import jax
import jax.numpy as jnp
from jax.experimental import pallas as pl
from jax.experimental.pallas import tpu as pltpu

_LANES = 128


def _clamp_kernel(x_ref, o_ref, *, lo, hi):
    # lo / hi are compile-time Python scalars (or None) -> lowered as
    # immediates; no captured-array constants.
    o_ref[...] = jnp.clip(x_ref[...], lo, hi).astype(o_ref.dtype)


def _sublane_multiple(dtype) -> int:
    # Sub-32-bit dtypes pack along sublanes: 8 rows for 4-byte, 16 for 2-byte,
    # 32 for 1-byte element types.
    itemsize = jnp.dtype(dtype).itemsize
    return max(8, 32 // max(itemsize, 1))


def _coerce_bounds(min_value, max_value, dtype):
    """Bounds as Python scalars in a type consistent with the input dtype."""
    def cast(v):
        if v is None:
            return None
        if jnp.issubdtype(dtype, jnp.integer):
            return int(v)          # exact integer clamp, no float round trip
        return float(v)
    return cast(min_value), cast(max_value)


def _clamp_bulk_2d(x2d, lo, hi, *, target_block_bytes, donate):
    """Clamp a lane-dense (rows, 128) slab with a tiled Pallas kernel."""
    rows, lanes = x2d.shape
    dtype = x2d.dtype
    itemsize = jnp.dtype(dtype).itemsize
    sub = _sublane_multiple(dtype)

    if rows <= sub:
        # Single block; full-extent sublane dim is exempt from the /8 rule.
        tile_rows = rows
    else:
        # ~2 MiB per block, sublane-aligned ...
        target_rows = max(sub, (target_block_bytes // (lanes * itemsize)) // sub * sub)
        # ... but never let one block swallow everything: keep >= 2 grid steps
        # so the "parallel" axis can be split across v7x's two TensorCores.
        half_rows = pl.cdiv(pl.cdiv(rows, 2), sub) * sub
        tile_rows = max(sub, min(target_rows, half_rows))

    grid = (pl.cdiv(rows, tile_rows),)   # last block may be partial (masked)

    kernel = functools.partial(_clamp_kernel, lo=lo, hi=hi)
    call_kwargs = {}
    if donate:
        call_kwargs["input_output_aliases"] = {0: 0}

    return pl.pallas_call(
        kernel,
        out_shape=jax.ShapeDtypeStruct((rows, lanes), dtype),
        grid=grid,
        in_specs=[pl.BlockSpec((tile_rows, lanes), lambda i: (i, 0))],
        out_specs=pl.BlockSpec((tile_rows, lanes), lambda i: (i, 0)),
        compiler_params=pltpu.CompilerParams(
            dimension_semantics=("parallel",)),
        cost_estimate=pl.CostEstimate(
            flops=2 * rows * lanes,
            transcendentals=0,
            bytes_accessed=2 * rows * lanes * itemsize),
        **call_kwargs,
    )(x2d)


def _clamp_forward(x, min_value, max_value, *,
                   target_block_bytes=2 << 20, donate_input=False):
    """Element-wise clamp of an arbitrarily-shaped array via a Pallas kernel."""
    total = x.size
    if total == 0:
        return x

    orig_shape = x.shape
    dtype = x.dtype
    lo, hi = _coerce_bounds(min_value, max_value, dtype)

    x_flat = x.reshape(-1)
    tail = total % _LANES
    bulk = total - tail

    pieces = []
    if bulk:
        x2d = x_flat[:bulk].reshape(bulk // _LANES, _LANES)
        out2d = _clamp_bulk_2d(x2d, lo, hi,
                               target_block_bytes=target_block_bytes,
                               donate=donate_input)
        pieces.append(out2d.reshape(-1))
    if tail:
        # <128 trailing elements: clamp them with plain jnp instead of padding
        # the whole tensor (avoids a full-tensor HBM pad + slice round trip).
        pieces.append(jnp.clip(x_flat[bulk:], lo, hi).astype(dtype))

    out_flat = pieces[0] if len(pieces) == 1 else jnp.concatenate(pieces)
    return out_flat.reshape(orig_shape)


# ---- ClampWithGradient: forward = clamp, backward = grad_output with 1
# ---- substituted wherever x is outside [min_value, max_value].
@functools.partial(jax.custom_vjp, nondiff_argnums=(1, 2))
def custom_clamp(x, min_value, max_value):
    return _clamp_forward(x, min_value, max_value)


def _custom_clamp_fwd(x, min_value, max_value):
    return _clamp_forward(x, min_value, max_value), x


def _custom_clamp_bwd(min_value, max_value, x, g):
    out_of_range = jnp.zeros(x.shape, dtype=bool)
    if min_value is not None:
        out_of_range = out_of_range | (x < min_value)
    if max_value is not None:
        out_of_range = out_of_range | (x > max_value)
    grad_x = jnp.where(out_of_range, jnp.ones((), g.dtype), g)
    return (grad_x,)


custom_clamp.defvjp(_custom_clamp_fwd, _custom_clamp_bwd)


class CustomClampPallas:
    """JAX/Pallas equivalent of the PyTorch CustomClamp module."""

    def __init__(self, min_value, max_value):
        self.min_value = min_value
        self.max_value = max_value

    def __call__(self, x):
        return custom_clamp(x, self.min_value, self.max_value)


if __name__ == "__main__":
    key = jax.random.PRNGKey(0)
    k0, k1, k2 = jax.random.split(key, 3)

    module = CustomClampPallas(min_value=-0.5, max_value=0.5)

    # NCHW input consistent with typical usage: batch=2, channels=4, 16x16.
    x = jax.random.normal(k0, (2, 4, 16, 16), dtype=jnp.float32) * 2.0
    y = jax.block_until_ready(module(x))
    y_ref = jnp.clip(x, -0.5, 0.5)
    assert y.shape == x.shape and y.dtype == x.dtype
    assert jnp.allclose(y, y_ref), "mismatch vs reference clamp (aligned case)"

    # Ragged total (exercises partial trailing block + <128-element tail path).
    x_rag = jax.random.normal(k1, (5, 300), dtype=jnp.float32) * 2.0
    y_rag = jax.block_until_ready(module(x_rag))
    assert jnp.allclose(y_rag, jnp.clip(x_rag, -0.5, 0.5)), "mismatch (ragged case)"

    # Gradient check vs ClampWithGradient.backward semantics:
    # grad = upstream grad inside the range, forced to 1 outside it.
    w = jax.random.normal(k2, x.shape, dtype=jnp.float32)
    g = jax.grad(lambda t: jnp.sum(module(t) * w))(x)
    g_ref = jnp.where((x < -0.5) | (x > 0.5), 1.0, w)
    assert jnp.allclose(g, g_ref), "mismatch vs reference custom gradient"

    print("KERNEL_OK")
</pallas_src>

<mosaic_0001>
module attributes {stable_mosaic.version = 11 : i64} {
  func.func @_clamp_kernel(%arg0: i32, %arg1: memref<8x128xf32, #tpu.memory_space<vmem>>, %arg2: memref<8x128xf32, #tpu.memory_space<vmem>>) attributes {dimension_semantics = [#tpu.dimension_semantics<parallel>], iteration_bounds = array<i64: 2>, scalar_prefetch = 0 : i64, scratch_operands = 0 : i64, tpu.core_type = #tpu.core_type<tc>, window_params = [{transform_indices = @transform_0, window_bounds = array<i64: 8, 128>}, {transform_indices = @transform_1, window_bounds = array<i64: 8, 128>}]} {
    %c0 = arith.constant 0 : index
    %c0_0 = arith.constant 0 : index
    %0 = vector.load %arg1[%c0, %c0_0] : memref<8x128xf32, #tpu.memory_space<vmem>>, vector<8x128xf32>
    %cst = arith.constant -5.000000e-01 : f32
    %cst_1 = arith.constant 5.000000e-01 : f32
    %1 = vector.broadcast %cst : f32 to vector<8x128xf32>
    %2 = arith.maximumf %1, %0 : vector<8x128xf32>
    %3 = vector.broadcast %cst_1 : f32 to vector<8x128xf32>
    %4 = arith.minimumf %3, %2 : vector<8x128xf32>
    %c0_2 = arith.constant 0 : index
    %c0_3 = arith.constant 0 : index
    %5 = vector.load %arg2[%c0_2, %c0_3] : memref<8x128xf32, #tpu.memory_space<vmem>>, vector<8x128xf32>
    tpu.vector_store %arg2[%c0_2, %c0_3], %4 {strides = array<i32>} : memref<8x128xf32, #tpu.memory_space<vmem>>, vector<8x128xf32>,
    return
  }
  func.func @transform_0(%arg0: i32) -> (i32, i32) {
    %c0_i32 = arith.constant 0 : i32
    %c0_i32_0 = arith.constant 0 : i32
    return %arg0, %c0_i32 : i32, i32
  }
  func.func @transform_1(%arg0: i32) -> (i32, i32) {
    %c0_i32 = arith.constant 0 : i32
    %c0_i32_0 = arith.constant 0 : i32
    return %arg0, %c0_i32 : i32, i32
  }
}

</mosaic_0001>

<bundles_post_ra>
// kernel: tpu_custom_call.1
= control target key start
LH: loop header
LB: loop body
LE: loop exit
PB: predicated region body
PF: predicated region fallthrough
CT: control target
= control target key end

     0   :  { %6 = vsyncpa [#allocation3], 0  ;;  %s550_s0 = inlined_call_operand.hbm [shape: f32[16,128], index: 0, kind: input, shape index: {}]   ;;  %s551_s1 = inlined_call_operand.hbm [shape: f32[16,128], index: 1, kind: output, shape index: {}]  }
   0x1   :  { %8 = vsyncpa [#allocation3 + $0x1], 0 }
   0x2   :  { %9 = vsyncpa [#allocation4], 0 }
   0x3   :  { %11 = vsyncpa [#allocation4 + $0x1], 0  ;;  %s389_s6 = smov 0   ;;  %s391_s7 = smov 0  }
   0x4   :  { %s393_s8 = smov 0   ;;  %s395_s9 = smov 0  }
   0x5 LB: > { %s410_s10 = sadd.s32 4294967295, %s375_s9   ;;  %s220_s11 = sadd.s32 4294967294, %s375_s9   ;;  %s375_s9 = sphi %s395_s9, %s566_s9   ;;  %s371_s8 = sphi %s393_s8, %s565_s8   ;;  %s367_s7 = sphi %s391_s7, %s564_s7   ;;  %s363_s6 = sphi %s389_s6, %s563_s6  }
   0x6   : > { %s414_s12 = sadd.s32 1, %s375_s9   ;;  %s24_s13 = sadd.s32 1, %s371_s8 }
   0x7   : > { %s21_s14 = ssub.s32 %s375_s9, %s414_s12  ;;  %p31_p0 = scmp.ne.s32.totalorder %s371_s8, %s367_s7 }
   0x8   : > { %p22_p1 = scmp.eq.s32.totalorder %s21_s14, 0  ;;  %p32_p2 = scmp.eq.s32.totalorder %s375_s9, 0 }
   0x9   : > { %p37_p3 = scmp.ne.s32.totalorder %s367_s7, %s363_s6  ;;  %p38_p4 = scmp.eq.s32.totalorder %s410_s10, 0 }
   0xa   : > { %s426_s15 = scalar_select %p22_p1, %s371_s8, %s24_s13  }
   0xb   : > { %p428_p5 = por %p32_p2, %p31_p0  ;;  %p432_p6 = por %p38_p4, %p37_p3 }
   0xc   : > { %p61_p7 = scmp.eq.s32.totalorder %s410_s10, 1  ;;  %p67_p8 = scmp.eq.s32.totalorder %s220_s11, 1 }
   0xd   : > { %p245_p10 = scmp.lt.s32.totalorder %s375_s9, 2  ;;  %s87_s20 = sand.u32 1, %s371_s8  }
   0xe   : > { %p439_p11 = por %p61_p7, %p31_p0  ;;  %p443_p12 = por %p67_p8, %p37_p3 }
   0xf   : > { %s224_s21 = sshll.u32 %s375_s9, 7  ;;  %s223_s22 = sshll.u32 %s87_s20, 3 }
  0x10   : > { %s555_s18 = scalar_select %p439_p11, 1, 0 }
  0x11   : > { %s556_s19 = scalar_select %p443_p12, 1, 0 }
  0x12   : > { %s452_s25 = scalar_lea.hbm %s550_s0, %s224_s21  ;;  %s91_s26 = scalar_lea.vmem [#allocation2], %s223_s22 }
  0x13   : > { %s98_s27 = sshll.u32 %s91_s26, 4  ;;  %p456_p13 = pnand %p245_p10, %p428_p5  ;;  %s460_s27 = int_to_ptr.vmem [resolvable:$true] %s98_s27 }
  0x14   : > { %s88_s29 = scalar_lea.sflag [#allocation3], %s87_s20  ;;  %s279_s30 = scalar_lea.hbm %s452_s25, 128 }
  0x15   : > { %p280_p2 = scmp.ne.s32.totalorder %s452_s25, %s279_s30  ;;  %p281_p3 = pneg %p456_p13 }
  0x16   : > { %s284_s4 = scalar_lea.hbm %s550_s0, 256  ;;  %p285_p5 = scmp.lt.u32.totalorder %s452_s25, %s550_s0 }
  0x17   : > { %p282_p4 = pnand %p281_p3, %p280_p2  ;;  %p286_p8 = scmp.lt.u32.totalorder %s284_s4, %s279_s30 }
  0x18   : > { %p288_p9 = scmp.lt.u32.totalorder %s279_s30, %s452_s25 }
  0x19   : > { %p283_p7 = pneg %p282_p4  ;;  %p287_p10 = por %p286_p8, %p285_p5 }
  0x1b   : > { %p289_p0 = por %p288_p9, %p287_p10 }
  0x1d   : > { %p290_p1 = pnand %p289_p0, %p283_p7 }
  0x1f   : > { %293 = shalt.err (!%p290_p1)
}
  0x20   : > { %s294_s13 = scalar_lea.vmem %s460_s27, 128  ;;  %s377_s14 = smov [#allocation2]  }
  0x21   : > { %p295_p2 = scmp.ne.s32.totalorder %s460_s27, %s294_s13  ;;  %s299_s16 = sshll.u32 %s377_s14, 4  ;;  %s300_s16 = int_to_ptr.vmem [resolvable:$false] %s299_s16 }
  0x22   : > { %s301_s20 = scalar_lea.vmem %s300_s16, 256  ;;  %p302_p11 = scmp.lt.s32.totalorder %s460_s27, %s300_s16 }
  0x23   : > { %p297_p4 = pnand %p295_p2, %p281_p3  ;;  %p303_p5 = scmp.lt.s32.totalorder %s301_s20, %s294_s13 }
  0x25   : > { %p298_p12 = pneg %p297_p4  ;;  %p304_p8 = por %p303_p5, %p302_p11 }
  0x27   : > { %p305_p9 = pnand %p304_p8, %p298_p12 }
  0x29   : > { %308 = shalt.err (!%p305_p9)
}
  0x2a   : > { %240 = dma.hbm_to_vmem [thread:$0]  (!%p456_p13), %s452_s25, 128, %s460_s27, %s88_s29  }
  0x2b   : > { %p558_p0 = scmp.lt.s32.totalorder %s375_s9, 3  ;;  %p559_p1 = scmp.ge.s32.totalorder %s375_s9, 1 }
  0x2d   : > { %p104_p3 = pnand %p559_p1, %p558_p0 }
  0x2e   : > { %s494_s21 = sand.u32 (!%p104_p3), 1, %s367_s7  }
  0x2f   : > { %107 = sbr.rel (%p104_p3) target bundleno = 81 (0x51), region = 24  ;;  %s226_s22 = sshll.u32 (!%p104_p3), %s494_s21, 3 }
  0x30   : > { %s110_s23 = scalar_lea.sflag (!%p104_p3), [#allocation3], %s494_s21  ;;  %s113_s24 = scalar_lea.vmem (!%p104_p3), [#allocation2], %s226_s22 }
  0x36   : > { %354 = dma.done.wait (%p432_p6), %s110_s23, 128  }
  0x37   : > { %356 = vsyncadd (%p432_p6), %s110_s23, 4294967168  ;;  %s131_s25 = scalar_lea.vmem [#allocation5], %s226_s22  ;;  %s230_s27 = sshll.u32 %s410_s10, 7  ;;  %v132_v0 = vld [vmem:[%s113_s24] sm:$0xff] }
  0x38   : > { %s150_s26 = sshll.u32 %s131_s25, 4  ;;  %v228_v1 = vclamps-f32 %v132_v0, 0.5  ;;  %s508_s30 = scalar_lea.hbm %s551_s1, %s230_s27  ;;  %s503_s26 = int_to_ptr.vmem [resolvable:$true] %s150_s26 }
  0x39   : > { %s137_s17 = scalar_lea.sflag [#allocation4], %s494_s21  ;;  %s309_s2 = scalar_lea.vmem %s503_s26, 128 }
  0x3a   : > { %135 = vst [vmem:[%s131_s25] sm:$0xff] %v228_v1  ;;  %p310_p6 = scmp.ne.s32.totalorder %s503_s26, %s309_s2  ;;  %p560_p11 = scmp.ne.s32.totalorder %s555_s18, 0 }
  0x3b   : > { %s378_s10 = smov [#allocation5]  }
  0x3c   : > { %p311_p12 = pnand %p310_p6, %p560_p11  ;;  %s313_s3 = sshll.u32 %s378_s10, 4  ;;  %s314_s3 = int_to_ptr.vmem [resolvable:$false] %s313_s3 }
  0x3d   : > { %s315_s4 = scalar_lea.vmem %s314_s3, 256  ;;  %p316_p7 = scmp.lt.s32.totalorder %s503_s26, %s314_s3 }
  0x3e   : > { %p312_p13 = pneg %p311_p12  ;;  %p317_p10 = scmp.lt.s32.totalorder %s315_s4, %s309_s2 }
  0x40   : > { %p318_p2 = por %p317_p10, %p316_p7 }
  0x42   : > { %p319_p4 = pnand %p318_p2, %p312_p13 }
  0x44   : > { %322 = shalt.err (!%p319_p4)
}
  0x45   : > { %s323_s5 = scalar_lea.hbm %s508_s30, 128  ;;  %s327_s14 = scalar_lea.hbm %s551_s1, 256 }
  0x46   : > { %p324_p5 = scmp.ne.s32.totalorder %s508_s30, %s323_s5  ;;  %p328_p0 = scmp.lt.u32.totalorder %s508_s30, %s551_s1 }
  0x47   : > { %p329_p1 = scmp.lt.u32.totalorder %s327_s14, %s323_s5  ;;  %p331_p6 = scmp.lt.u32.totalorder %s323_s5, %s508_s30 }
  0x48   : > { %p325_p8 = pnand %p324_p5, %p560_p11 }
  0x49   : > { %p330_p3 = por %p329_p1, %p328_p0 }
  0x4a   : > { %p326_p9 = pneg %p325_p8 }
  0x4b   : > { %p332_p12 = por %p331_p6, %p330_p3 }
  0x4d   : > { %p333_p13 = pnand %p332_p12, %p326_p9 }
  0x4f   : > { %336 = shalt.err (!%p333_p13)
}
  0x50   : > { %235 = dma.vmem_to_hbm [thread:$0]  (%p560_p11), %s503_s26, 128, %s508_s30, %s137_s17  }
  0x51 PF: > { %s162_s21 = sand.u32 1, %s363_s6   ;;  %p561_p7 = scmp.ne.s32.totalorder %s556_s19, 0 }
  0x52   : > { %p562_p10 = scmp.ge.s32.totalorder %s375_s9, 2  ;;  %s163_s22 = scalar_lea.sflag [#allocation4], %s162_s21 }
  0x54   : > { %p242_p2 = pnand %p562_p10, %p561_p7 }
  0x56   : > { %358 = dma.done.wait (!%p242_p2), %s163_s22, 128  }
  0x57   : > { %360 = vsyncadd (!%p242_p2), %s163_s22, 4294967168  ;;  %p14_p4 = scmp.ge.s32.totalorder %s414_s12, 4   ;;  %s563_s6 = smov %s367_s7 }
  0x58   : > { %s564_s7 = smov %s371_s8  ;;  %s565_s8 = smov %s426_s15 }
  0x59   : > { %s566_s9 = smov %s414_s12  ;;  %16 = sbr.rel (!%p14_p4) target bundleno = 5 (0x5), region = 69 }
  0x60   :  { %168 = vsyncpa [#allocation3], 1 }
  0x61   :  { %170 = vsyncpa [#allocation3 + $0x1], 1 }
  0x62   :  { %171 = vsyncpa [#allocation4], 1 }
  0x63   :  { %173 = vsyncpa [#allocation4 + $0x1], 1 }

</bundles_post_ra>
